<compile_context>
chip_gen: v7x
topology: tpu7x:2x2x1
jax: 0.10.0
libtpu: 0.0.40
codegen_flags: <defaults>
</compile_context>

<pallas_src>
import jax
import jax.numpy as jnp
import numpy as np
from jax.experimental import pallas as pl
from jax.experimental.pallas import tpu as pltpu

# ---------------- problem sizes (small, consistent with an image classifier) --
B = 8            # batch
CIN, H, W = 4, 16, 16
D = CIN * H * W  # flattened feature dim = 1024
NUM_CLASSES = 10
M = 3            # number of ensemble members
CPAD = 128       # per-model class dim padded to one lane-register width
NF = M * CPAD    # fused class dim (384)

# tie-break score = count * (1<<16) - pred must not overflow / alias:
assert CPAD < (1 << 16) and (M + 1) * (1 << 16) < (1 << 31)


def ensemble_kernel(x_ref, w_ref, b_ref, out_ref):
    """x_ref: (B, D) bf16, w_ref: (D, M*CPAD) bf16, b_ref: (1, M*CPAD) f32,
    out_ref: (B, CPAD) i32 -> majority-vote class id broadcast across lanes."""
    # Single fused MXU pass for all M models (bf16 inputs, f32 accumulation).
    logits = jnp.dot(x_ref[...], w_ref[...], preferred_element_type=jnp.float32)
    logits = logits + b_ref[...]                      # (B, NF) f32; pad classes = -1e30

    col_idx = jax.lax.broadcasted_iota(jnp.int32, (B, CPAD), 1)

    preds = []
    for m in range(M):                                # M is small & static
        lm = logits[:, m * CPAD:(m + 1) * CPAD]       # static 128-lane slice
        mx = jnp.max(lm, axis=-1, keepdims=True)      # (B, 1)
        # first index achieving the max (matches torch.argmax semantics)
        idx = jnp.where(lm == mx, col_idx, CPAD)
        preds.append(jnp.min(idx, axis=-1, keepdims=True).astype(jnp.int32))

    # mode across the M models; ties on count broken toward the smallest label
    BIG = jnp.int32(1 << 16)
    best_score = jnp.full((B, 1), -1, dtype=jnp.int32)
    best_val = jnp.zeros((B, 1), dtype=jnp.int32)
    for i in range(M):
        count_i = jnp.zeros((B, 1), jnp.int32)
        for j in range(M):
            count_i = count_i + (preds[j] == preds[i]).astype(jnp.int32)
        score_i = count_i * BIG - preds[i]            # max count, then min label
        better = score_i > best_score
        best_score = jnp.where(better, score_i, best_score)
        best_val = jnp.where(better, preds[i], best_val)

    # lane-dense writeback (unmasked vst, full-line DMA)
    out_ref[...] = jnp.broadcast_to(best_val, (B, CPAD))


def prepare_ensemble_params(weights, biases):
    """One-time padding + model fusion, hoisted out of the forward hot path.

    weights: (M, D, NUM_CLASSES) f32, biases: (M, NUM_CLASSES) f32
    returns: w_fused (D, M*CPAD) bf16, b_fused (1, M*CPAD) f32
    """
    w_pad = jnp.zeros((M, D, CPAD), jnp.float32).at[:, :, :NUM_CLASSES].set(weights)
    b_pad = jnp.full((M, CPAD), -1e30, jnp.float32).at[:, :NUM_CLASSES].set(biases)
    w_fused = jnp.transpose(w_pad, (1, 0, 2)).reshape(D, NF).astype(jnp.bfloat16)
    b_fused = b_pad.reshape(1, NF)
    return jax.device_put(w_fused), jax.device_put(b_fused)


_COST = pl.CostEstimate(
    flops=2 * B * D * NF,
    transcendentals=0,
    bytes_accessed=B * D * 2 + D * NF * 2 + NF * 4 + B * CPAD * 4,
)


@jax.jit
def ensemble_mode_forward(x_nchw, labels, w_fused, b_fused):
    """Returns (y_pred_label, output_true) like Ensemble_mode.forward."""
    x_flat = x_nchw.reshape(B, D).astype(jnp.bfloat16)

    grid_spec = pltpu.PrefetchScalarGridSpec(
        num_scalar_prefetch=0,
        grid=(1,),
        # NOTE: if B ever grows beyond one tile, add a "parallel" batch grid
        # axis (tiles of 128-256 rows) so v7x's second TensorCore is used.
        in_specs=[
            pl.BlockSpec((B, D), lambda i: (0, 0)),
            pl.BlockSpec((D, NF), lambda i: (0, 0)),
            pl.BlockSpec((1, NF), lambda i: (0, 0)),
        ],
        out_specs=pl.BlockSpec((B, CPAD), lambda i: (0, 0)),
    )

    preds = pl.pallas_call(
        ensemble_kernel,
        out_shape=jax.ShapeDtypeStruct((B, CPAD), jnp.int32),
        grid_spec=grid_spec,
        compiler_params=pltpu.CompilerParams(
            dimension_semantics=("arbitrary",)),
        cost_estimate=_COST,
    )(x_flat, w_fused, b_fused)

    y_pred_label = preds[:, 0]           # (B,) int32, the ensembled labels
    output_true = labels.squeeze(1)      # (B,) labels.squeeze(1), as in torch
    return y_pred_label, output_true


def _reference(x_nchw, weights, biases):
    """Pure-NumPy reference using bf16-rounded inputs + f32 accumulation
    (matches the kernel's MXU dtype path)."""
    x_flat = np.asarray(
        jnp.asarray(x_nchw).reshape(B, D).astype(jnp.bfloat16).astype(jnp.float32))
    w = np.asarray(jnp.asarray(weights).astype(jnp.bfloat16).astype(jnp.float32))
    b = np.asarray(biases, np.float32)
    per_model = np.stack(
        [np.argmax(x_flat @ w[m] + b[m], axis=-1) for m in range(M)], axis=0
    )  # (M, B)
    out = np.zeros((B,), np.int32)
    for s in range(B):
        vals, counts = np.unique(per_model[:, s], return_counts=True)
        modal = vals[counts == counts.max()]
        out[s] = modal.min()             # tie-break: smallest modal label
    return out


if __name__ == "__main__":
    key = jax.random.PRNGKey(0)
    kx, kw, kb, kl = jax.random.split(key, 4)

    x = jax.random.normal(kx, (B, CIN, H, W), dtype=jnp.float32)      # NCHW
    labels = jax.random.randint(kl, (B, 1), 0, NUM_CLASSES, dtype=jnp.int32)
    weights = 0.05 * jax.random.normal(kw, (M, D, NUM_CLASSES), dtype=jnp.float32)
    biases = 0.05 * jax.random.normal(kb, (M, NUM_CLASSES), dtype=jnp.float32)

    # one-time parameter prep (padding + fusion + bf16 cast), outside hot path
    w_fused, b_fused = prepare_ensemble_params(weights, biases)

    y_pred, y_true = ensemble_mode_forward(x, labels, w_fused, b_fused)
    y_pred = jax.block_until_ready(y_pred)
    y_true = jax.block_until_ready(y_true)

    ref = _reference(x, weights, biases)
    assert np.array_equal(np.asarray(y_pred), ref), (y_pred, ref)
    assert np.array_equal(np.asarray(y_true), np.asarray(labels).squeeze(1))

    print("KERNEL_OK")
</pallas_src>

<mosaic_0001>
module attributes {stable_mosaic.version = 11 : i64} {
  func.func @ensemble_kernel(%arg0: i32, %arg1: memref<8x1024xbf16, #tpu.memory_space<vmem>>, %arg2: memref<1024x384xbf16, #tpu.memory_space<vmem>>, %arg3: memref<1x384xf32, #tpu.memory_space<vmem>>, %arg4: memref<8x128xi32, #tpu.memory_space<vmem>>) attributes {dimension_semantics = [#tpu.dimension_semantics<arbitrary>], iteration_bounds = array<i64: 1>, scalar_prefetch = 0 : i64, scratch_operands = 0 : i64, tpu.core_type = #tpu.core_type<tc>, window_params = [{pipeline_mode = #tpu.pipeline_mode<synchronous>, transform_indices = @transform_0, window_bounds = array<i64: 8, 1024>}, {pipeline_mode = #tpu.pipeline_mode<synchronous>, transform_indices = @transform_1, window_bounds = array<i64: 1024, 384>}, {pipeline_mode = #tpu.pipeline_mode<synchronous>, transform_indices = @transform_2, window_bounds = array<i64: 1, 384>}, {pipeline_mode = #tpu.pipeline_mode<synchronous>, transform_indices = @transform_3, window_bounds = array<i64: 8, 128>}]} {
    %c0 = arith.constant 0 : index
    %c0_0 = arith.constant 0 : index
    %0 = vector.load %arg1[%c0, %c0_0] : memref<8x1024xbf16, #tpu.memory_space<vmem>>, vector<8x1024xbf16>
    %c0_1 = arith.constant 0 : index
    %c0_2 = arith.constant 0 : index
    %1 = vector.load %arg2[%c0_1, %c0_2] : memref<1024x384xbf16, #tpu.memory_space<vmem>>, vector<1024x384xbf16>
    %cst = arith.constant dense<0.000000e+00> : vector<8x384xf32>
    %2 = tpu.matmul %0, %1, %cst {dimension_numbers = #tpu.dot_dimension_numbers<[1], [0], [0], [1], [0, 0, 1, 1], [], []>} : vector<8x1024xbf16>, vector<1024x384xbf16>, vector<8x384xf32> -> vector<8x384xf32>
    %c0_3 = arith.constant 0 : index
    %c0_4 = arith.constant 0 : index
    %3 = vector.load %arg3[%c0_3, %c0_4] : memref<1x384xf32, #tpu.memory_space<vmem>>, vector<1x384xf32>
    %4 = vector.broadcast %3 : vector<1x384xf32> to vector<8x384xf32>
    %5 = arith.addf %2, %4 : vector<8x384xf32>
    %6 = tpu.iota {dimensions = array<i32: 1>} : vector<8x128xi32>
    %7 = vector.extract_strided_slice %5 {offsets = [0, 0], sizes = [8, 128], strides = [1, 1]} : vector<8x384xf32> to vector<8x128xf32>
    %cst_5 = arith.constant dense<0xFF800000> : vector<8xf32>
    %8 = vector.multi_reduction <maximumf>, %7, %cst_5 [1] : vector<8x128xf32> to vector<8xf32>
    %9 = vector.shape_cast %8 : vector<8xf32> to vector<8x1xf32>
    %10 = vector.broadcast %9 : vector<8x1xf32> to vector<8x128xf32>
    %11 = arith.cmpf oeq, %7, %10 : vector<8x128xf32>
    %c128_i32 = arith.constant 128 : i32
    %12 = vector.broadcast %c128_i32 : i32 to vector<8x128xi32>
    %13 = arith.select %11, %6, %12 : vector<8x128xi1>, vector<8x128xi32>
    %cst_6 = arith.constant dense<2147483647> : vector<8xi32>
    %14 = vector.multi_reduction <minsi>, %13, %cst_6 [1] : vector<8x128xi32> to vector<8xi32>
    %15 = vector.shape_cast %14 : vector<8xi32> to vector<8x1xi32>
    %16 = vector.extract_strided_slice %5 {offsets = [0, 128], sizes = [8, 128], strides = [1, 1]} : vector<8x384xf32> to vector<8x128xf32>
    %cst_7 = arith.constant dense<0xFF800000> : vector<8xf32>
    %17 = vector.multi_reduction <maximumf>, %16, %cst_7 [1] : vector<8x128xf32> to vector<8xf32>
    %18 = vector.shape_cast %17 : vector<8xf32> to vector<8x1xf32>
    %19 = vector.broadcast %18 : vector<8x1xf32> to vector<8x128xf32>
    %20 = arith.cmpf oeq, %16, %19 : vector<8x128xf32>
    %c128_i32_8 = arith.constant 128 : i32
    %21 = vector.broadcast %c128_i32_8 : i32 to vector<8x128xi32>
    %22 = arith.select %20, %6, %21 : vector<8x128xi1>, vector<8x128xi32>
    %cst_9 = arith.constant dense<2147483647> : vector<8xi32>
    %23 = vector.multi_reduction <minsi>, %22, %cst_9 [1] : vector<8x128xi32> to vector<8xi32>
    %24 = vector.shape_cast %23 : vector<8xi32> to vector<8x1xi32>
    %25 = vector.extract_strided_slice %5 {offsets = [0, 256], sizes = [8, 128], strides = [1, 1]} : vector<8x384xf32> to vector<8x128xf32>
    %cst_10 = arith.constant dense<0xFF800000> : vector<8xf32>
    %26 = vector.multi_reduction <maximumf>, %25, %cst_10 [1] : vector<8x128xf32> to vector<8xf32>
    %27 = vector.shape_cast %26 : vector<8xf32> to vector<8x1xf32>
    %28 = vector.broadcast %27 : vector<8x1xf32> to vector<8x128xf32>
    %29 = arith.cmpf oeq, %25, %28 : vector<8x128xf32>
    %c128_i32_11 = arith.constant 128 : i32
    %30 = vector.broadcast %c128_i32_11 : i32 to vector<8x128xi32>
    %31 = arith.select %29, %6, %30 : vector<8x128xi1>, vector<8x128xi32>
    %cst_12 = arith.constant dense<2147483647> : vector<8xi32>
    %32 = vector.multi_reduction <minsi>, %31, %cst_12 [1] : vector<8x128xi32> to vector<8xi32>
    %33 = vector.shape_cast %32 : vector<8xi32> to vector<8x1xi32>
    %c-1_i32 = arith.constant -1 : i32
    %34 = vector.broadcast %c-1_i32 : i32 to vector<8x1xi32>
    %c0_i32 = arith.constant 0 : i32
    %35 = vector.broadcast %c0_i32 : i32 to vector<8x1xi32>
    %c0_i32_13 = arith.constant 0 : i32
    %36 = vector.broadcast %c0_i32_13 : i32 to vector<8x1xi32>
    %37 = arith.cmpi eq, %15, %15 : vector<8x1xi32>
    %38 = arith.extui %37 : vector<8x1xi1> to vector<8x1xi32>
    %39 = arith.addi %36, %38 : vector<8x1xi32>
    %40 = arith.cmpi eq, %24, %15 : vector<8x1xi32>
    %41 = arith.extui %40 : vector<8x1xi1> to vector<8x1xi32>
    %42 = arith.addi %39, %41 : vector<8x1xi32>
    %43 = arith.cmpi eq, %33, %15 : vector<8x1xi32>
    %44 = arith.extui %43 : vector<8x1xi1> to vector<8x1xi32>
    %45 = arith.addi %42, %44 : vector<8x1xi32>
    %c65536_i32 = arith.constant 65536 : i32
    %46 = vector.broadcast %c65536_i32 : i32 to vector<8x1xi32>
    %47 = arith.muli %45, %46 : vector<8x1xi32>
    %48 = arith.subi %47, %15 : vector<8x1xi32>
    %49 = arith.cmpi sgt, %48, %34 : vector<8x1xi32>
    %50 = arith.select %49, %48, %34 : vector<8x1xi1>, vector<8x1xi32>
    %51 = arith.select %49, %15, %35 : vector<8x1xi1>, vector<8x1xi32>
    %c0_i32_14 = arith.constant 0 : i32
    %52 = vector.broadcast %c0_i32_14 : i32 to vector<8x1xi32>
    %53 = arith.cmpi eq, %15, %24 : vector<8x1xi32>
    %54 = arith.extui %53 : vector<8x1xi1> to vector<8x1xi32>
    %55 = arith.addi %52, %54 : vector<8x1xi32>
    %56 = arith.cmpi eq, %24, %24 : vector<8x1xi32>
    %57 = arith.extui %56 : vector<8x1xi1> to vector<8x1xi32>
    %58 = arith.addi %55, %57 : vector<8x1xi32>
    %59 = arith.cmpi eq, %33, %24 : vector<8x1xi32>
    %60 = arith.extui %59 : vector<8x1xi1> to vector<8x1xi32>
    %61 = arith.addi %58, %60 : vector<8x1xi32>
    %c65536_i32_15 = arith.constant 65536 : i32
    %62 = vector.broadcast %c65536_i32_15 : i32 to vector<8x1xi32>
    %63 = arith.muli %61, %62 : vector<8x1xi32>
    %64 = arith.subi %63, %24 : vector<8x1xi32>
    %65 = arith.cmpi sgt, %64, %50 : vector<8x1xi32>
    %66 = arith.select %65, %64, %50 : vector<8x1xi1>, vector<8x1xi32>
    %67 = arith.select %65, %24, %51 : vector<8x1xi1>, vector<8x1xi32>
    %c0_i32_16 = arith.constant 0 : i32
    %68 = vector.broadcast %c0_i32_16 : i32 to vector<8x1xi32>
    %69 = arith.cmpi eq, %15, %33 : vector<8x1xi32>
    %70 = arith.extui %69 : vector<8x1xi1> to vector<8x1xi32>
    %71 = arith.addi %68, %70 : vector<8x1xi32>
    %72 = arith.cmpi eq, %24, %33 : vector<8x1xi32>
    %73 = arith.extui %72 : vector<8x1xi1> to vector<8x1xi32>
    %74 = arith.addi %71, %73 : vector<8x1xi32>
    %75 = arith.cmpi eq, %33, %33 : vector<8x1xi32>
    %76 = arith.extui %75 : vector<8x1xi1> to vector<8x1xi32>
    %77 = arith.addi %74, %76 : vector<8x1xi32>
    %c65536_i32_17 = arith.constant 65536 : i32
    %78 = vector.broadcast %c65536_i32_17 : i32 to vector<8x1xi32>
    %79 = arith.muli %77, %78 : vector<8x1xi32>
    %80 = arith.subi %79, %33 : vector<8x1xi32>
    %81 = arith.cmpi sgt, %80, %66 : vector<8x1xi32>
    %82 = arith.select %81, %33, %67 : vector<8x1xi1>, vector<8x1xi32>
    %83 = vector.shape_cast %82 : vector<8x1xi32> to vector<8x1xi32>
    %84 = vector.broadcast %83 : vector<8x1xi32> to vector<8x128xi32>
    %c0_18 = arith.constant 0 : index
    %c0_19 = arith.constant 0 : index
    %85 = vector.load %arg4[%c0_18, %c0_19] : memref<8x128xi32, #tpu.memory_space<vmem>>, vector<8x128xi32>
    tpu.vector_store %arg4[%c0_18, %c0_19], %84 {strides = array<i32>} : memref<8x128xi32, #tpu.memory_space<vmem>>, vector<8x128xi32>,
    return
  }
  func.func @transform_0(%arg0: i32) -> (i32, i32) {
    %c0_i32 = arith.constant 0 : i32
    %c0_i32_0 = arith.constant 0 : i32
    %c0_i32_1 = arith.constant 0 : i32
    return %c0_i32, %c0_i32_0 : i32, i32
  }
  func.func @transform_1(%arg0: i32) -> (i32, i32) {
    %c0_i32 = arith.constant 0 : i32
    %c0_i32_0 = arith.constant 0 : i32
    %c0_i32_1 = arith.constant 0 : i32
    return %c0_i32, %c0_i32_0 : i32, i32
  }
  func.func @transform_2(%arg0: i32) -> (i32, i32) {
    %c0_i32 = arith.constant 0 : i32
    %c0_i32_0 = arith.constant 0 : i32
    %c0_i32_1 = arith.constant 0 : i32
    return %c0_i32, %c0_i32_0 : i32, i32
  }
  func.func @transform_3(%arg0: i32) -> (i32, i32) {
    %c0_i32 = arith.constant 0 : i32
    %c0_i32_0 = arith.constant 0 : i32
    %c0_i32_1 = arith.constant 0 : i32
    return %c0_i32, %c0_i32_0 : i32, i32
  }
}

</mosaic_0001>

<bundles_post_ra>
// kernel: ensemble_mode_forward.1
= control target key start
LH: loop header
LB: loop body
LE: loop exit
PB: predicated region body
PF: predicated region fallthrough
CT: control target
= control target key end

     0   :  { %8 = vsyncpa [#allocation3], 0  ;;  %s2368_s12 = smov [#allocation2]   ;;  %s2458_s0 = inlined_call_operand.vmem [shape: bf16[8,1024], index: 0, kind: input, shape index: {}]   ;;  %s2459_s1 = inlined_call_operand.hbm [shape: bf16[1024,384], index: 1, kind: input, shape index: {}]   ;;  %s2460_s2 = inlined_call_operand.vmem [shape: f32[1,384], index: 2, kind: input, shape index: {}]   ;;  %s2461_s3 = inlined_call_operand.vmem [shape: s32[8,128], index: 3, kind: output, shape index: {}]  }
   0x1   :  { %s16_s13 = sshll.u32 %s2368_s12, 4  ;;  %s2344_s16 = scalar_lea.hbm %s2459_s1, 24576  ;;  %s17_s13 = int_to_ptr.vmem [resolvable:$true] %s16_s13 }
   0x2   :  { %p2345_p0 = scmp.ne.s32.totalorder %s2459_s1, %s2344_s16  ;;  %p2348_p1 = scmp.lt.u32.totalorder %s2344_s16, %s2459_s1 }
   0x4   :  { %p2350_p2 = pnand %p2348_p1, %p2345_p0 }
   0x6   :  { %2353 = shalt.err (!%p2350_p2)
}
   0x7   :  { %s2354_s21 = scalar_lea.vmem %s17_s13, 24576  ;;  %p2359_p4 = scmp.lt.s32.totalorder %s17_s13, %s17_s13 }
   0x8   :  { %p2355_p3 = scmp.ne.s32.totalorder %s17_s13, %s2354_s21  ;;  %p2360_p5 = scmp.lt.s32.totalorder %s2354_s21, %s2354_s21 }
   0xa   :  { %p2361_p6 = por %p2360_p5, %p2359_p4 }
   0xc   :  { %p2362_p7 = pnand %p2361_p6, %p2355_p3 }
   0xe   :  { %2365 = shalt.err (!%p2362_p7)
}
   0xf   :  { %s2369_s22 = smov 192   ;;  %s2370_s23 = smov 12  }
  0x10   :  { %22 = dma.hbm_to_vmem [thread:$0]  %s2459_s1, 24576, %s17_s13, [#allocation3], %s2369_s22, %s2369_s22, %s2370_s23  }
  0x11   :  { %2366 = dma.done.wait [#allocation3], 24576  }
  0x12   :  { %2367 = vsyncadd [#allocation3], 4294942720  ;;  %v2080_v0 = vld [vmem:[#allocation2 + $0x4] ss:$12 sps:$4 sm:$0xff]   ;;  %v2084_v2 = vld [vmem:[#allocation2] ss:$12 sps:$4 sm:$0xff]  }
  0x13   :  { %v2082_v1 = vld [vmem:[#allocation2 + $0x184] ss:$12 sps:$4 sm:$0xff]   ;;  %1358 = vmatprep.subr.bf16.mxu1 %v2080_v0  ;;  %v2085_v3 = vld [vmem:[#allocation2 + $0x180] ss:$12 sps:$4 sm:$0xff]   ;;  %v2086_v4 = vld [vmem:[#allocation2 + $0x1c] ss:$12 sps:$4 sm:$0xff]  }
  0x14   :  { %1399 = vmatprep.subr.bf16.mxu0 %v2082_v1  ;;  %1359 = vmatpush1.bf16.msra.mxu1 %v2084_v2  ;;  %v2088_v5 = vld [vmem:[#allocation2 + $0x19c] ss:$12 sps:$4 sm:$0xff]   ;;  %v2090_v6 = vld [vmem:[#allocation2 + $0x18] ss:$12 sps:$4 sm:$0xff]   ;;  %v2092_v8 = vld [vmem:[#allocation2 + $0x34] ss:$12 sps:$4 sm:$0xff]  }
  0x15   :  { %1400 = vmatpush1.bf16.msra.mxu0 %v2085_v3  ;;  %1360 = vmatprep.subr.bf16.mxu1 %v2086_v4  ;;  %v2091_v7 = vld [vmem:[#allocation2 + $0x198] ss:$12 sps:$4 sm:$0xff]   ;;  %v2094_v9 = vld [vmem:[#allocation2 + $0x1b4] ss:$12 sps:$4 sm:$0xff]   ;;  %v2096_v10 = vld [vmem:[#allocation2 + $0x30] ss:$12 sps:$4 sm:$0xff]  }
  0x16   :  { %1401 = vmatprep.subr.bf16.mxu0 %v2088_v5  ;;  %v2097_v11 = vld [vmem:[#allocation2 + $0x1b0] ss:$12 sps:$4 sm:$0xff]   ;;  %v2098_v12 = vld [vmem:[#allocation2 + $0x4c] ss:$12 sps:$4 sm:$0xff]   ;;  %v2102_v14 = vld [vmem:[#allocation2 + $0x48] ss:$12 sps:$4 sm:$0xff]  }
  0x17   :  { %v2100_v13 = vld [vmem:[#allocation2 + $0x1cc] ss:$12 sps:$4 sm:$0xff]   ;;  %v2103_v15 = vld [vmem:[#allocation2 + $0x1c8] ss:$12 sps:$4 sm:$0xff]   ;;  %v2104_v16 = vld [vmem:[#allocation2 + $0x64] ss:$12 sps:$4 sm:$0xff]  }
  0x18   :  { %1361 = vmatpush1.bf16.msra.mxu1 %v2090_v6  ;;  %v2106_v17 = vld [vmem:[#allocation2 + $0x1e4] ss:$12 sps:$4 sm:$0xff]   ;;  %v2108_v18 = vld [vmem:[#allocation2 + $0x60] ss:$12 sps:$4 sm:$0xff]   ;;  %v2110_v20 = vld [vmem:[#allocation2 + $0x7c] ss:$12 sps:$4 sm:$0xff]  }
  0x19   :  { %1402 = vmatpush1.bf16.msra.mxu0 %v2091_v7  ;;  %1362 = vmatprep.subr.bf16.mxu1 %v2092_v8  ;;  %v2109_v19 = vld [vmem:[#allocation2 + $0x1e0] ss:$12 sps:$4 sm:$0xff]   ;;  %v2112_v21 = vld [vmem:[#allocation2 + $0x1fc] ss:$12 sps:$4 sm:$0xff]   ;;  %v2114_v22 = vld [vmem:[#allocation2 + $0x78] ss:$12 sps:$4 sm:$0xff]  }
  0x1a   :  { %1403 = vmatprep.subr.bf16.mxu0 %v2094_v9  ;;  %v2115_v23 = vld [vmem:[#allocation2 + $0x1f8] ss:$12 sps:$4 sm:$0xff]   ;;  %v2116_v24 = vld [vmem:[#allocation2 + $0x94] ss:$12 sps:$4 sm:$0xff]   ;;  %v2120_v26 = vld [vmem:[#allocation2 + $0x90] ss:$12 sps:$4 sm:$0xff]  }
  0x1b   :  { %v2118_v25 = vld [vmem:[#allocation2 + $0x214] ss:$12 sps:$4 sm:$0xff]   ;;  %v2121_v27 = vld [vmem:[#allocation2 + $0x210] ss:$12 sps:$4 sm:$0xff]   ;;  %v2122_v28 = vld [vmem:[#allocation2 + $0xac] ss:$12 sps:$4 sm:$0xff]  }
  0x1c   :  { %1363 = vmatpush1.bf16.msra.mxu1 %v2096_v10  ;;  %v2124_v29 = vld [vmem:[#allocation2 + $0x22c] ss:$12 sps:$4 sm:$0xff]   ;;  %v2126_v30 = vld [vmem:[#allocation2 + $0xa8] ss:$12 sps:$4 sm:$0xff]   ;;  %v2128_v32 = vld [vmem:[#allocation2 + $0xc4] ss:$12 sps:$4 sm:$0xff]  }
  0x1d   :  { %1404 = vmatpush1.bf16.msra.mxu0 %v2097_v11  ;;  %1364 = vmatprep.subr.bf16.mxu1 %v2098_v12  ;;  %v2127_v31 = vld [vmem:[#allocation2 + $0x228] ss:$12 sps:$4 sm:$0xff]   ;;  %v2130_v33 = vld [vmem:[#allocation2 + $0x244] ss:$12 sps:$4 sm:$0xff]   ;;  %v2132_v34 = vld [vmem:[#allocation2 + $0xc0] ss:$12 sps:$4 sm:$0xff]  }
  0x1e   :  { %1405 = vmatprep.subr.bf16.mxu0 %v2100_v13  ;;  %v2133_v35 = vld [vmem:[#allocation2 + $0x240] ss:$12 sps:$4 sm:$0xff]   ;;  %v2134_v36 = vld [vmem:[#allocation2 + $0xdc] ss:$12 sps:$4 sm:$0xff]   ;;  %v2138_v38 = vld [vmem:[#allocation2 + $0xd8] ss:$12 sps:$4 sm:$0xff]  }
  0x1f   :  { %v2136_v37 = vld [vmem:[#allocation2 + $0x25c] ss:$12 sps:$4 sm:$0xff]   ;;  %v2139_v39 = vld [vmem:[#allocation2 + $0x258] ss:$12 sps:$4 sm:$0xff]   ;;  %v2140_v40 = vld [vmem:[#allocation2 + $0xf4] ss:$12 sps:$4 sm:$0xff]  }
  0x20   :  { %1365 = vmatpush1.bf16.msra.mxu1 %v2102_v14  ;;  %v2142_v41 = vld [vmem:[#allocation2 + $0x274] ss:$12 sps:$4 sm:$0xff]   ;;  %v2144_v42 = vld [vmem:[#allocation2 + $0xf0] ss:$12 sps:$4 sm:$0xff]   ;;  %v2146_v44 = vld [vmem:[#allocation2 + $0x10c] ss:$12 sps:$4 sm:$0xff]  }
  0x21   :  { %1406 = vmatpush1.bf16.msra.mxu0 %v2103_v15  ;;  %1366 = vmatprep.subr.bf16.mxu1 %v2104_v16  ;;  %v2145_v43 = vld [vmem:[#allocation2 + $0x270] ss:$12 sps:$4 sm:$0xff]   ;;  %v2148_v45 = vld [vmem:[#allocation2 + $0x28c] ss:$12 sps:$4 sm:$0xff]   ;;  %v2150_v46 = vld [vmem:[#allocation2 + $0x108] ss:$12 sps:$4 sm:$0xff]  }
  0x22   :  { %1407 = vmatprep.subr.bf16.mxu0 %v2106_v17  ;;  %v29_v47 = vld [vmem:[%s2458_s0] sm:$0xff]  ;;  %v30_v49 = vld [vmem:[%s2458_s0 + $0x8] sm:$0xff]  ;;  %v2168_v62 = vld [vmem:[#allocation2 + $0x150] ss:$12 sps:$4 sm:$0xff]  }
  0x23   :  { %v2407_v48 = vcombine.high %v29_v47, %v29_v47  ;;  %v2151_v50 = vld [vmem:[#allocation2 + $0x288] ss:$12 sps:$4 sm:$0xff]   ;;  %v2152_v51 = vld [vmem:[#allocation2 + $0x124] ss:$12 sps:$4 sm:$0xff]   ;;  %v2412_v52 = vcombine.high %v30_v49, %v30_v49  ;;  %v2156_v54 = vld [vmem:[#allocation2 + $0x120] ss:$12 sps:$4 sm:$0xff]   ;;  %v2416_v6 = vcombine.low %v29_v47, %v29_v47  ;;  %v2418_v7 = vcombine.low %v30_v49, %v30_v49 }
  0x24   :  { %1367 = vmatpush1.bf16.msra.mxu1 %v2108_v18  ;;  %v2154_v53 = vld [vmem:[#allocation2 + $0x2a4] ss:$12 sps:$4 sm:$0xff]   ;;  %v2157_v55 = vld [vmem:[#allocation2 + $0x2a0] ss:$12 sps:$4 sm:$0xff]   ;;  %v2158_v56 = vld [vmem:[#allocation2 + $0x13c] ss:$12 sps:$4 sm:$0xff]  }
  0x25   :  { %1408 = vmatpush1.bf16.msra.mxu0 %v2109_v19  ;;  %1368 = vmatprep.subr.bf16.mxu1 %v2110_v20  ;;  %v2160_v57 = vld [vmem:[#allocation2 + $0x2bc] ss:$12 sps:$4 sm:$0xff]   ;;  %v2162_v58 = vld [vmem:[#allocation2 + $0x138] ss:$12 sps:$4 sm:$0xff]   ;;  %v2164_v60 = vld [vmem:[#allocation2 + $0x154] ss:$12 sps:$4 sm:$0xff]  }
  0x26   :  { %1409 = vmatprep.subr.bf16.mxu0 %v2112_v21  ;;  %1390 = vmatprep.mubr.bf16.mxu1 %v2407_v48  ;;  %v2163_v59 = vld [vmem:[#allocation2 + $0x2b8] ss:$12 sps:$4 sm:$0xff]   ;;  %v2166_v61 = vld [vmem:[#allocation2 + $0x2d4] ss:$12 sps:$4 sm:$0xff]   ;;  %v2169_v63 = vld [vmem:[#allocation2 + $0x2d0] ss:$12 sps:$4 sm:$0xff]  }
  0x27   :  { %1431 = vmatprep.mubr.bf16.mxu0 %v2412_v52  ;;  %v2170_v0 = vld [vmem:[#allocation2 + $0x16c] ss:$12 sps:$4 sm:$0xff]   ;;  %v2174_v2 = vld [vmem:[#allocation2 + $0x168] ss:$12 sps:$4 sm:$0xff]   ;;  %v2182_v4 = vld [vmem:[#allocation2 + $0x304] ss:$12 sps:$4 sm:$0xff]  }
  0x28   :  { %1369 = vmatpush1.bf16.msra.mxu1 %v2114_v22  ;;  %v2172_v1 = vld [vmem:[#allocation2 + $0x2ec] ss:$12 sps:$4 sm:$0xff]   ;;  %v2175_v3 = vld [vmem:[#allocation2 + $0x2e8] ss:$12 sps:$4 sm:$0xff]   ;;  %v2190_v16 = vld [vmem:[#allocation2 + $0x330] ss:$12 sps:$4 sm:$0xff]  }
  0x29   :  { %1410 = vmatpush1.bf16.msra.mxu0 %v2115_v23  ;;  %1370 = vmatprep.subr.bf16.mxu1 %v2116_v24  ;;  %v2183_v5 = vld [vmem:[#allocation2 + $0xc8] ss:$12 sps:$4 sm:$0xff]   ;;  %v2180_v8 = vld [vmem:[#allocation2 + $0x300] ss:$12 sps:$4 sm:$0xff]   ;;  %v2185_v12 = vld [vmem:[#allocation2 + $0x318] ss:$12 sps:$4 sm:$0xff]  }
  0x2a   :  { %1411 = vmatprep.subr.bf16.mxu0 %v2118_v25  ;;  %v2184_v9 = vld [vmem:[#allocation2 + $0x8] ss:$12 sps:$4 sm:$0xff]   ;;  %v2188_v11 = vld [vmem:[#allocation2 + $0xe0] ss:$12 sps:$4 sm:$0xff]   ;;  %v2193_v15 = vld [vmem:[#allocation2 + $0xf8] ss:$12 sps:$4 sm:$0xff]  }
  0x2b   :  { %v2187_v10 = vld [vmem:[#allocation2 + $0x31c] ss:$12 sps:$4 sm:$0xff]   ;;  %v2189_v13 = vld [vmem:[#allocation2 + $0x20] ss:$12 sps:$4 sm:$0xff]   ;;  %v2194_v17 = vld [vmem:[#allocation2 + $0x38] ss:$12 sps:$4 sm:$0xff]  }
  0x2c   :  { %1371 = vmatpush1.bf16.msra.mxu1 %v2120_v26  ;;  %v2192_v14 = vld [vmem:[#allocation2 + $0x334] ss:$12 sps:$4 sm:$0xff]   ;;  %v2197_v18 = vld [vmem:[#allocation2 + $0x34c] ss:$12 sps:$4 sm:$0xff]   ;;  %v2198_v19 = vld [vmem:[#allocation2 + $0x110] ss:$12 sps:$4 sm:$0xff]  }
  0x2d   :  { %1412 = vmatpush1.bf16.msra.mxu0 %v2121_v27  ;;  %1372 = vmatprep.subr.bf16.mxu1 %v2122_v28  ;;  %v2195_v20 = vld [vmem:[#allocation2 + $0x348] ss:$12 sps:$4 sm:$0xff]   ;;  %v2199_v21 = vld [vmem:[#allocation2 + $0x50] ss:$12 sps:$4 sm:$0xff]   ;;  %v2200_v24 = vld [vmem:[#allocation2 + $0x360] ss:$12 sps:$4 sm:$0xff]  }
  0x2e   :  { %1413 = vmatprep.subr.bf16.mxu0 %v2124_v29  ;;  %v2202_v22 = vld [vmem:[#allocation2 + $0x364] ss:$12 sps:$4 sm:$0xff]   ;;  %v2203_v23 = vld [vmem:[#allocation2 + $0x128] ss:$12 sps:$4 sm:$0xff]   ;;  %v2208_v27 = vld [vmem:[#allocation2 + $0x140] ss:$12 sps:$4 sm:$0xff]  }
  0x2f   :  { %v2204_v25 = vld [vmem:[#allocation2 + $0x68] ss:$12 sps:$4 sm:$0xff]   ;;  %v2205_v28 = vld [vmem:[#allocation2 + $0x378] ss:$12 sps:$4 sm:$0xff]   ;;  %v2209_v29 = vld [vmem:[#allocation2 + $0x80] ss:$12 sps:$4 sm:$0xff]  }
  0x30   :  { %1373 = vmatpush1.bf16.msra.mxu1 %v2126_v30  ;;  %v2207_v26 = vld [vmem:[#allocation2 + $0x37c] ss:$12 sps:$4 sm:$0xff]   ;;  %v2212_v30 = vld [vmem:[#allocation2 + $0x394] ss:$12 sps:$4 sm:$0xff]   ;;  %v2233_v49 = vld [vmem:[#allocation2 + $0x278] ss:$12 sps:$4 sm:$0xff]  }
  0x31   :  { %1414 = vmatpush1.bf16.msra.mxu0 %v2127_v31  ;;  %1374 = vmatprep.subr.bf16.mxu1 %v2128_v32  ;;  %v2213_v31 = vld [vmem:[#allocation2 + $0x158] ss:$12 sps:$4 sm:$0xff]   ;;  %v2210_v32 = vld [vmem:[#allocation2 + $0x390] ss:$12 sps:$4 sm:$0xff]   ;;  %v2229_v47 = vld [vmem:[#allocation2 + $0x1a0] ss:$12 sps:$4 sm:$0xff]  }
  0x32   :  { %1415 = vmatprep.subr.bf16.mxu0 %v2130_v33  ;;  %v2214_v33 = vld [vmem:[#allocation2 + $0x98] ss:$12 sps:$4 sm:$0xff]  }
  0x34   :  { %1375 = vmatpush1.bf16.msra.mxu1 %v2132_v34  ;;  %v2217_v34 = vld [vmem:[#allocation2 + $0x3ac] ss:$12 sps:$4 sm:$0xff]  }
  0x35   :  { %1416 = vmatpush1.bf16.msra.mxu0 %v2133_v35  ;;  %1376 = vmatprep.subr.bf16.mxu1 %v2134_v36  ;;  %v2218_v35 = vld [vmem:[#allocation2 + $0x170] ss:$12 sps:$4 sm:$0xff]   ;;  %v2215_v36 = vld [vmem:[#allocation2 + $0x3a8] ss:$12 sps:$4 sm:$0xff]  }
  0x36   :  { %1417 = vmatprep.subr.bf16.mxu0 %v2136_v37  ;;  %v2219_v37 = vld [vmem:[#allocation2 + $0xb0] ss:$12 sps:$4 sm:$0xff]  }
  0x38   :  { %1377 = vmatpush1.bf16.msra.mxu1 %v2138_v38  ;;  %v2222_v38 = vld [vmem:[#allocation2 + $0x3c4] ss:$12 sps:$4 sm:$0xff]  }
  0x39   :  { %1418 = vmatpush1.bf16.msra.mxu0 %v2139_v39  ;;  %1378 = vmatprep.subr.bf16.mxu1 %v2140_v40  ;;  %v2223_v39 = vld [vmem:[#allocation2 + $0x248] ss:$12 sps:$4 sm:$0xff]   ;;  %v2220_v40 = vld [vmem:[#allocation2 + $0x3c0] ss:$12 sps:$4 sm:$0xff]  }
  0x3a   :  { %1419 = vmatprep.subr.bf16.mxu0 %v2142_v41  ;;  %v2224_v41 = vld [vmem:[#allocation2 + $0x188] ss:$12 sps:$4 sm:$0xff]  }
  0x3c   :  { %1379 = vmatpush1.bf16.msra.mxu1 %v2144_v42  ;;  %v2227_v42 = vld [vmem:[#allocation2 + $0x3dc] ss:$12 sps:$4 sm:$0xff]  }
  0x3d   :  { %1420 = vmatpush1.bf16.msra.mxu0 %v2145_v43  ;;  %1380 = vmatprep.subr.bf16.mxu1 %v2146_v44  ;;  %v2426_v43 = vld [vmem:[%s2458_s0 + $0x10] sm:$0xff]  ;;  %v2228_v44 = vld [vmem:[#allocation2 + $0x260] ss:$12 sps:$4 sm:$0xff]  }
  0x3e   :  { %1421 = vmatprep.subr.bf16.mxu0 %v2148_v45  ;;  %v2430_v45 = vcombine.high %v2426_v43, %v2426_v43 }
  0x40   :  { %1381 = vmatpush1.bf16.msra.mxu1 %v2150_v46  ;;  %v2225_v46 = vld [vmem:[#allocation2 + $0x3d8] ss:$12 sps:$4 sm:$0xff]  }
  0x41   :  { %1422 = vmatpush1.bf16.msra.mxu0 %v2151_v50  ;;  %1382 = vmatprep.subr.bf16.mxu1 %v2152_v51  ;;  %v2230_v50 = vld [vmem:[#allocation2 + $0x3f0] ss:$12 sps:$4 sm:$0xff]   ;;  %v2234_v51 = vld [vmem:[#allocation2 + $0x1b8] ss:$12 sps:$4 sm:$0xff]  }
  0x42   :  { %1423 = vmatprep.subr.bf16.mxu0 %v2154_v53  ;;  %v2237_v53 = vld [vmem:[#allocation2 + $0x40c] ss:$12 sps:$4 sm:$0xff]  }
  0x44   :  { %1383 = vmatpush1.bf16.msra.mxu1 %v2156_v54  ;;  %v2238_v54 = vld [vmem:[#allocation2 + $0x290] ss:$12 sps:$4 sm:$0xff]  }
  0x45   :  { %1424 = vmatpush1.bf16.msra.mxu0 %v2157_v55  ;;  %1384 = vmatprep.subr.bf16.mxu1 %v2158_v56  ;;  %v2235_v55 = vld [vmem:[#allocation2 + $0x408] ss:$12 sps:$4 sm:$0xff]   ;;  %v2239_v56 = vld [vmem:[#allocation2 + $0x1d0] ss:$12 sps:$4 sm:$0xff]  }
  0x46   :  { %1425 = vmatprep.subr.bf16.mxu0 %v2160_v57  ;;  %v2242_v57 = vld [vmem:[#allocation2 + $0x424] ss:$12 sps:$4 sm:$0xff]  }
  0x48   :  { %1385 = vmatpush1.bf16.msra.mxu1 %v2162_v58  ;;  %v2243_v58 = vld [vmem:[#allocation2 + $0x2a8] ss:$12 sps:$4 sm:$0xff]  }
  0x49   :  { %1426 = vmatpush1.bf16.msra.mxu0 %v2163_v59  ;;  %1386 = vmatprep.subr.bf16.mxu1 %v2164_v60  ;;  %v2240_v59 = vld [vmem:[#allocation2 + $0x420] ss:$12 sps:$4 sm:$0xff]   ;;  %v2244_v60 = vld [vmem:[#allocation2 + $0x1e8] ss:$12 sps:$4 sm:$0xff]  }
  0x4a   :  { %1427 = vmatprep.subr.bf16.mxu0 %v2166_v61  ;;  %v2248_v61 = vld [vmem:[#allocation2 + $0x2c0] ss:$12 sps:$4 sm:$0xff]  }
  0x4c   :  { %1387 = vmatpush1.bf16.msra.mxu1 %v2168_v62  ;;  %v2245_v62 = vld [vmem:[#allocation2 + $0x438] ss:$12 sps:$4 sm:$0xff]  }
  0x4d   :  { %1428 = vmatpush1.bf16.msra.mxu0 %v2169_v63  ;;  %1388 = vmatprep.subr.bf16.mxu1 %v2170_v0  ;;  %v2249_v63 = vld [vmem:[#allocation2 + $0x200] ss:$12 sps:$4 sm:$0xff]  }
  0x4e   :  { %1429 = vmatprep.subr.bf16.mxu0 %v2172_v1  ;;  %v2252_v0 = vld [vmem:[#allocation2 + $0x454] ss:$12 sps:$4 sm:$0xff]   ;;  %v2253_v1 = vld [vmem:[#allocation2 + $0x2d8] ss:$12 sps:$4 sm:$0xff]  }
  0x50   :  { %1389 = vmatpush1.bf16.msra.mxu1 %v2174_v2  ;;  %v2250_v2 = vld [vmem:[#allocation2 + $0x450] ss:$12 sps:$4 sm:$0xff]  }
  0x51   :  { %1430 = vmatpush1.bf16.msra.mxu0 %v2175_v3  ;;  %1976 = vmatprep.subr.bf16.mxu1 %v2183_v5  ;;  %v2254_v3 = vld [vmem:[#allocation2 + $0x218] ss:$12 sps:$4 sm:$0xff]   ;;  %v2258_v5 = vld [vmem:[#allocation2 + $0x2f0] ss:$12 sps:$4 sm:$0xff]  }
  0x52   :  { %1440 = vmatprep.subr.bf16.mxu0 %v2182_v4  ;;  %v2257_v4 = vld [vmem:[#allocation2 + $0x46c] ss:$12 sps:$4 sm:$0xff]  }
  0x53   :  { %1391 = vmatmul.mubr.bf16.vlgmr.msra.gmra.mrb[0].mxu1 %v2416_v6 }
  0x54   :  { %1432 = vmatmul.mubr.bf16.vlgmr.msra.gmra.mrb[0].mxu0 %v2418_v7  ;;  %1977 = vmatpush3.bf16.msra.mxu1 %v2184_v9  ;;  %v2264_v9 = vld [vmem:[#allocation2 + $0x484] ss:$12 sps:$4 sm:$0xff]  }
  0x55   :  { %1441 = vmatpush1.bf16.msra.mxu0 %v2180_v8  ;;  %1978 = vmatprep.subr.bf16.mxu1 %v2188_v11  ;;  %v2259_v8 = vld [vmem:[#allocation2 + $0x230] ss:$12 sps:$4 sm:$0xff]   ;;  %v2262_v11 = vld [vmem:[#allocation2 + $0x480] ss:$12 sps:$4 sm:$0xff]  }
  0x56   :  { %1442 = vmatprep.subr.bf16.mxu0 %v2187_v10  ;;  %1554 = vmatprep.mubr.bf16.mxu1 %v2407_v48  ;;  %v2232_v48 = vld [vmem:[#allocation2 + $0x3f4] ss:$12 sps:$4 sm:$0xff]  }
  0x57   :  { %1472 = vmatprep.mubr.bf16.mxu0 %v2430_v45  ;;  %v2265_v10 = vld [vmem:[#allocation2 + $0x3c8] ss:$12 sps:$4 sm:$0xff]  }
  0x58   :  { %1979 = vmatpush3.bf16.msra.mxu1 %v2189_v13  ;;  %v2266_v13 = vld [vmem:[#allocation2 + $0x308] ss:$12 sps:$4 sm:$0xff]  }
  0x59   :  { %1443 = vmatpush1.bf16.msra.mxu0 %v2185_v12  ;;  %1980 = vmatprep.subr.bf16.mxu1 %v2193_v15  ;;  %v2437_v12 = vcombine.low %v2426_v43, %v2426_v43  ;;  %v2270_v15 = vld [vmem:[#allocation2 + $0x3e0] ss:$12 sps:$4 sm:$0xff]   ;;  %v2304_v43 = vld [vmem:[#allocation2 + $0x544] ss:$12 sps:$4 sm:$0xff]  }
  0x5a   :  { %1444 = vmatprep.subr.bf16.mxu0 %v2192_v14  ;;  %v2269_v14 = vld [vmem:[#allocation2 + $0x49c] ss:$12 sps:$4 sm:$0xff]  }
  0x5c   :  { %1981 = vmatpush3.bf16.msra.mxu1 %v2194_v17  ;;  %v2271_v17 = vld [vmem:[#allocation2 + $0x320] ss:$12 sps:$4 sm:$0xff]  }
  0x5d   :  { %1445 = vmatpush1.bf16.msra.mxu0 %v2190_v16  ;;  %1982 = vmatprep.subr.bf16.mxu1 %v2198_v19  ;;  %v2267_v16 = vld [vmem:[#allocation2 + $0x498] ss:$12 sps:$4 sm:$0xff]  }
  0x5e   :  { %1446 = vmatprep.subr.bf16.mxu0 %v2197_v18  ;;  %v2274_v18 = vld [vmem:[#allocation2 + $0x4b4] ss:$12 sps:$4 sm:$0xff]   ;;  %v2275_v19 = vld [vmem:[#allocation2 + $0x3f8] ss:$12 sps:$4 sm:$0xff]  }
  0x60   :  { %1983 = vmatpush3.bf16.msra.mxu1 %v2199_v21  ;;  %v2276_v21 = vld [vmem:[#allocation2 + $0x338] ss:$12 sps:$4 sm:$0xff]  }
  0x61   :  { %1447 = vmatpush1.bf16.msra.mxu0 %v2195_v20  ;;  %1984 = vmatprep.subr.bf16.mxu1 %v2203_v23  ;;  %v2272_v20 = vld [vmem:[#allocation2 + $0x4b0] ss:$12 sps:$4 sm:$0xff]   ;;  %v2277_v23 = vld [vmem:[#allocation2 + $0x4c8] ss:$12 sps:$4 sm:$0xff]  }
  0x62   :  { %1448 = vmatprep.subr.bf16.mxu0 %v2202_v22  ;;  %v2279_v22 = vld [vmem:[#allocation2 + $0x4cc] ss:$12 sps:$4 sm:$0xff]  }
  0x64   :  { %1985 = vmatpush3.bf16.msra.mxu1 %v2204_v25  ;;  %v2284_v25 = vld [vmem:[#allocation2 + $0x4e4] ss:$12 sps:$4 sm:$0xff]  }
  0x65   :  { %1449 = vmatpush1.bf16.msra.mxu0 %v2200_v24  ;;  %1986 = vmatprep.subr.bf16.mxu1 %v2208_v27  ;;  %v2281_v24 = vld [vmem:[#allocation2 + $0x350] ss:$12 sps:$4 sm:$0xff]   ;;  %v2282_v27 = vld [vmem:[#allocation2 + $0x4e0] ss:$12 sps:$4 sm:$0xff]  }
  0x66   :  { %1450 = vmatprep.subr.bf16.mxu0 %v2207_v26  ;;  %v2285_v26 = vld [vmem:[#allocation2 + $0x428] ss:$12 sps:$4 sm:$0xff]  }
  0x68   :  { %1987 = vmatpush3.bf16.msra.mxu1 %v2209_v29  ;;  %v2289_v29 = vld [vmem:[#allocation2 + $0x4fc] ss:$12 sps:$4 sm:$0xff]  }
  0x69   :  { %1451 = vmatpush1.bf16.msra.mxu0 %v2205_v28  ;;  %1988 = vmatprep.subr.bf16.mxu1 %v2213_v31  ;;  %v2286_v28 = vld [vmem:[#allocation2 + $0x368] ss:$12 sps:$4 sm:$0xff]   ;;  %v2287_v31 = vld [vmem:[#allocation2 + $0x4f8] ss:$12 sps:$4 sm:$0xff]  }
  0x6a   :  { %1452 = vmatprep.subr.bf16.mxu0 %v2212_v30  ;;  %v2290_v30 = vld [vmem:[#allocation2 + $0x440] ss:$12 sps:$4 sm:$0xff]  }
  0x6c   :  { %1989 = vmatpush3.bf16.msra.mxu1 %v2214_v33  ;;  %v2294_v33 = vld [vmem:[#allocation2 + $0x514] ss:$12 sps:$4 sm:$0xff]  }
  0x6d   :  { %1453 = vmatpush1.bf16.msra.mxu0 %v2210_v32  ;;  %1990 = vmatprep.subr.bf16.mxu1 %v2218_v35  ;;  %v2291_v32 = vld [vmem:[#allocation2 + $0x380] ss:$12 sps:$4 sm:$0xff]   ;;  %v2445_v35 = vld [vmem:[%s2458_s0 + $0x18] sm:$0xff] }
  0x6e   :  { %1454 = vmatprep.subr.bf16.mxu0 %v2217_v34  ;;  %v2295_v34 = vld [vmem:[#allocation2 + $0x458] ss:$12 sps:$4 sm:$0xff]  }
  0x70   :  { %1991 = vmatpush3.bf16.msra.mxu1 %v2219_v37  ;;  %v2292_v37 = vld [vmem:[#allocation2 + $0x510] ss:$12 sps:$4 sm:$0xff]  }
  0x71   :  { %1455 = vmatpush1.bf16.msra.mxu0 %v2215_v36  ;;  %1998 = vmatprep.subr.bf16.mxu1 %v2223_v39  ;;  %v1783_v36 = vcombine.high %v2445_v35, %v2445_v35  ;;  %v2299_v39 = vld [vmem:[#allocation2 + $0x52c] ss:$12 sps:$4 sm:$0xff]  }
  0x72   :  { %1456 = vmatprep.subr.bf16.mxu0 %v2222_v38  ;;  %v2296_v38 = vld [vmem:[#allocation2 + $0x398] ss:$12 sps:$4 sm:$0xff]  }
  0x73   :  { %1555 = vmatmul.mubr.bf16.vlgmr.msra.gmra.mrb[4].mxu1 %v2416_v6  ;;  %v2255_v6 = vld [vmem:[#allocation2 + $0x468] ss:$12 sps:$4 sm:$0xff]  }
  0x74   :  { %1999 = vmatpush3.bf16.msra.mxu1 %v2224_v41  ;;  %1594 = vmatprep.mubr.bf16.mxu1 %v2412_v52  ;;  %v2247_v52 = vld [vmem:[#allocation2 + $0x43c] ss:$12 sps:$4 sm:$0xff]  }
  0x75   :  { %1457 = vmatpush1.bf16.msra.mxu0 %v2220_v40  ;;  %2000 = vmatprep.subr.bf16.mxu1 %v2228_v44  ;;  %v2300_v40 = vld [vmem:[#allocation2 + $0x470] ss:$12 sps:$4 sm:$0xff]   ;;  %v2297_v41 = vld [vmem:[#allocation2 + $0x528] ss:$12 sps:$4 sm:$0xff]  }
  0x76   :  { %1458 = vmatprep.subr.bf16.mxu0 %v2227_v42  ;;  %v2301_v42 = vld [vmem:[#allocation2 + $0x3b0] ss:$12 sps:$4 sm:$0xff]   ;;  %v2305_v44 = vld [vmem:[#allocation2 + $0x548] ss:$12 sps:$4 sm:$0xff]  }
  0x78   :  { %2001 = vmatpush3.bf16.msra.mxu1 %v2229_v47  ;;  %v2309_v47 = vld [vmem:[#allocation2 + $0x55c] ss:$12 sps:$4 sm:$0xff]  }
  0x79   :  { %1459 = vmatpush1.bf16.msra.mxu0 %v2225_v46  ;;  %2002 = vmatprep.subr.bf16.mxu1 %v2233_v49  ;;  %v2306_v46 = vld [vmem:[#allocation2 + $0x488] ss:$12 sps:$4 sm:$0xff]   ;;  %v2307_v49 = vld [vmem:[#allocation2 + $0x558] ss:$12 sps:$4 sm:$0xff]  }
  0x7a   :  { %1460 = vmatprep.subr.bf16.mxu0 %v2232_v48  ;;  %v2310_v48 = vld [vmem:[#allocation2 + $0x560] ss:$12 sps:$4 sm:$0xff]  }
  0x7c   :  { %2003 = vmatpush3.bf16.msra.mxu1 %v2234_v51  ;;  %v2314_v51 = vld [vmem:[#allocation2 + $0x574] ss:$12 sps:$4 sm:$0xff]  }
  0x7d   :  { %1461 = vmatpush1.bf16.msra.mxu0 %v2230_v50  ;;  %2004 = vmatprep.subr.bf16.mxu1 %v2238_v54  ;;  %v2311_v50 = vld [vmem:[#allocation2 + $0x4a0] ss:$12 sps:$4 sm:$0xff]   ;;  %v2312_v54 = vld [vmem:[#allocation2 + $0x570] ss:$12 sps:$4 sm:$0xff]  }
  0x7e   :  { %1462 = vmatprep.subr.bf16.mxu0 %v2237_v53  ;;  %v2315_v53 = vld [vmem:[#allocation2 + $0x578] ss:$12 sps:$4 sm:$0xff]  }
  0x80   :  { %2005 = vmatpush3.bf16.msra.mxu1 %v2239_v56  ;;  %v2319_v56 = vld [vmem:[#allocation2 + $0x58c] ss:$12 sps:$4 sm:$0xff]  }
  0x81   :  { %1463 = vmatpush1.bf16.msra.mxu0 %v2235_v55  ;;  %2006 = vmatprep.subr.bf16.mxu1 %v2243_v58  ;;  %v2316_v55 = vld [vmem:[#allocation2 + $0x4b8] ss:$12 sps:$4 sm:$0xff]   ;;  %v2317_v58 = vld [vmem:[#allocation2 + $0x588] ss:$12 sps:$4 sm:$0xff]  }
  0x82   :  { %1464 = vmatprep.subr.bf16.mxu0 %v2242_v57  ;;  %v2320_v57 = vld [vmem:[#allocation2 + $0x590] ss:$12 sps:$4 sm:$0xff]  }
  0x84   :  { %2007 = vmatpush3.bf16.msra.mxu1 %v2244_v60  ;;  %v2324_v60 = vld [vmem:[#allocation2 + $0x5a4] ss:$12 sps:$4 sm:$0xff]  }
  0x85   :  { %1465 = vmatpush1.bf16.msra.mxu0 %v2240_v59  ;;  %2008 = vmatprep.subr.bf16.mxu1 %v2248_v61  ;;  %v2321_v59 = vld [vmem:[#allocation2 + $0x4d0] ss:$12 sps:$4 sm:$0xff]   ;;  %v2322_v61 = vld [vmem:[#allocation2 + $0x5a0] ss:$12 sps:$4 sm:$0xff]  }
  0x86   :  { %1466 = vmatprep.subr.bf16.mxu0 %v2247_v52  ;;  %v2325_v52 = vld [vmem:[#allocation2 + $0x5a8] ss:$12 sps:$4 sm:$0xff]  }
  0x88   :  { %2009 = vmatpush3.bf16.msra.mxu1 %v2249_v63  ;;  %v2329_v63 = vld [vmem:[#allocation2 + $0x5bc] ss:$12 sps:$4 sm:$0xff]  }
  0x89   :  { %1467 = vmatpush1.bf16.msra.mxu0 %v2245_v62  ;;  %2010 = vmatprep.subr.bf16.mxu1 %v2253_v1  ;;  %v2326_v62 = vld [vmem:[#allocation2 + $0x4e8] ss:$12 sps:$4 sm:$0xff]   ;;  %v2327_v1 = vld [vmem:[#allocation2 + $0x5b8] ss:$12 sps:$4 sm:$0xff]  }
  0x8a   :  { %1468 = vmatprep.subr.bf16.mxu0 %v2252_v0  ;;  %v2330_v0 = vld [vmem:[#allocation2 + $0x5c0] ss:$12 sps:$4 sm:$0xff]  }
  0x8c   :  { %2011 = vmatpush3.bf16.msra.mxu1 %v2254_v3  ;;  %v2334_v3 = vld [vmem:[#allocation2 + $0x5d4] ss:$12 sps:$4 sm:$0xff]  }
  0x8d   :  { %1469 = vmatpush1.bf16.msra.mxu0 %v2250_v2  ;;  %2012 = vmatprep.subr.bf16.mxu1 %v2258_v5  ;;  %v2331_v2 = vld [vmem:[#allocation2 + $0x500] ss:$12 sps:$4 sm:$0xff]   ;;  %v2332_v5 = vld [vmem:[#allocation2 + $0x5d0] ss:$12 sps:$4 sm:$0xff]  }
  0x8e   :  { %1470 = vmatprep.subr.bf16.mxu0 %v2257_v4  ;;  %v2335_v4 = vld [vmem:[#allocation2 + $0x5d8] ss:$12 sps:$4 sm:$0xff]  }
  0x90   :  { %2013 = vmatpush3.bf16.msra.mxu1 %v2259_v8  ;;  %v2339_v8 = vld [vmem:[#allocation2 + $0x5ec] ss:$12 sps:$4 sm:$0xff]  }
  0x91   :  { %1471 = vmatpush1.bf16.msra.mxu0 %v2255_v6  ;;  %2020 = vmatprep.subr.bf16.mxu1 %v2265_v10  ;;  %v2336_v6 = vld [vmem:[#allocation2 + $0x518] ss:$12 sps:$4 sm:$0xff]   ;;  %v2337_v10 = vld [vmem:[#allocation2 + $0x5e8] ss:$12 sps:$4 sm:$0xff]  }
  0x92   :  { %1481 = vmatprep.subr.bf16.mxu0 %v2264_v9  ;;  %v2340_v9 = vld [vmem:[#allocation2 + $0x5f0] ss:$12 sps:$4 sm:$0xff]  }
  0x93   :  { %1595 = vmatmul.mubr.bf16.vlgmr.msra.gmra.mrb[8].mxu1 %v2418_v7  ;;  %v2280_v7 = vld [vmem:[#allocation2 + $0x410] ss:$12 sps:$4 sm:$0xff]  }
  0x94   :  { %1473 = vmatmul.mubr.bf16.vlgmr.msra.gmra.mrb[0].mxu0 %v2437_v12  ;;  %2021 = vmatpush3.bf16.msra.mxu1 %v2266_v13 }
  0x95   :  { %1482 = vmatpush1.bf16.msra.mxu0 %v2262_v11  ;;  %2022 = vmatprep.subr.bf16.mxu1 %v2270_v15  ;;  %v2341_v11 = vld [vmem:[#allocation2 + $0x530] ss:$12 sps:$4 sm:$0xff]  }
  0x96   :  { %1483 = vmatprep.subr.bf16.mxu0 %v2269_v14  ;;  %1634 = vmatprep.mubr.bf16.mxu1 %v2430_v45  ;;  %v2302_v45 = vld [vmem:[#allocation2 + $0x540] ss:$12 sps:$4 sm:$0xff]  }
  0x97   :  { %1513 = vmatprep.mubr.bf16.mxu0 %v1783_v36 }
  0x98   :  { %2023 = vmatpush3.bf16.msra.mxu1 %v2271_v17 }
  0x99   :  { %1484 = vmatpush1.bf16.msra.mxu0 %v2267_v16  ;;  %2024 = vmatprep.subr.bf16.mxu1 %v2275_v19 }
  0x9a   :  { %1485 = vmatprep.subr.bf16.mxu0 %v2274_v18 }
  0x9c   :  { %2025 = vmatpush3.bf16.msra.mxu1 %v2276_v21 }
  0x9d   :  { %1486 = vmatpush1.bf16.msra.mxu0 %v2272_v20  ;;  %2026 = vmatprep.subr.bf16.mxu1 %v2280_v7 }
  0x9e   :  { %1487 = vmatprep.subr.bf16.mxu0 %v2279_v22  ;;  %v291_v22 = vlaneseq }
  0xa0   :  { %2027 = vmatpush3.bf16.msra.mxu1 %v2281_v24  ;;  %v292_v7 = vshrl.u32 %v291_v22, 7  ;;  %v289_v24 = vld [vmem:[%s2460_s2] sm:$0x7] }
  0xa1   :  { %1488 = vmatpush1.bf16.msra.mxu0 %v2277_v23  ;;  %2028 = vmatprep.subr.bf16.mxu1 %v2285_v26 }
  0xa2   :  { %1489 = vmatprep.subr.bf16.mxu0 %v2284_v25  ;;  %v301_v23 = vsub.s32 2, %v292_v7 }
  0xa4   :  { %2029 = vmatpush3.bf16.msra.mxu1 %v2286_v28  ;;  %v302_v25 = vrot.slane %v289_v24, %v301_v23 }
  0xa5   :  { %1490 = vmatpush1.bf16.msra.mxu0 %v2282_v27  ;;  %2030 = vmatprep.subr.bf16.mxu1 %v2290_v30 }
  0xa6   :  { %1491 = vmatprep.subr.bf16.mxu0 %v2289_v29 }
  0xa8   :  { %2031 = vmatpush3.bf16.msra.mxu1 %v2291_v32 }
  0xa9   :  { %1492 = vmatpush1.bf16.msra.mxu0 %v2287_v31  ;;  %2032 = vmatprep.subr.bf16.mxu1 %v2295_v34 }
  0xaa   :  { %1493 = vmatprep.subr.bf16.mxu0 %v2294_v33 }
  0xac   :  { %2033 = vmatpush3.bf16.msra.mxu1 %v2296_v38 }
  0xad   :  { %1494 = vmatpush1.bf16.msra.mxu0 %v2292_v37  ;;  %2034 = vmatprep.subr.bf16.mxu1 %v2300_v40  ;;  %v297_v40 = vsub.s32 1, %v292_v7 }
  0xae   :  { %1495 = vmatprep.subr.bf16.mxu0 %v2299_v39  ;;  %v293_v39 = vsub.s32 0, %v292_v7 }
  0xb0   :  { %2035 = vmatpush3.bf16.msra.mxu1 %v2301_v42  ;;  %v298_v42 = vrot.slane %v289_v24, %v297_v40 }
  0xb1   :  { %1496 = vmatpush1.bf16.msra.mxu0 %v2297_v41  ;;  %2042 = vmatprep.subr.bf16.mxu1 %v2305_v44  ;;  %v294_v41 = vrot.slane %v289_v24, %v293_v39 }
  0xb2   :  { %1497 = vmatprep.subr.bf16.mxu0 %v2304_v43 }
  0xb3   :  { %1635 = vmatmul.mubr.bf16.vlgmr.msra.gmra.mrb[12].mxu1 %v2437_v12  ;;  %v1782_v12 = vcombine.low %v2445_v35, %v2445_v35 }
  0xb4   :  { %2043 = vmatpush3.bf16.msra.mxu1 %v2306_v46  ;;  %1674 = vmatprep.mubr.bf16.mxu1 %v1783_v36 }
  0xb5   :  { %1498 = vmatpush1.bf16.msra.mxu0 %v2302_v45  ;;  %2044 = vmatprep.subr.bf16.mxu1 %v2310_v48 }
  0xb6   :  { %1499 = vmatprep.subr.bf16.mxu0 %v2309_v47 }
  0xb8   :  { %2045 = vmatpush3.bf16.msra.mxu1 %v2311_v50 }
  0xb9   :  { %1500 = vmatpush1.bf16.msra.mxu0 %v2307_v49  ;;  %2046 = vmatprep.subr.bf16.mxu1 %v2315_v53 }
  0xba   :  { %1501 = vmatprep.subr.bf16.mxu0 %v2314_v51 }
  0xbc   :  { %2047 = vmatpush3.bf16.msra.mxu1 %v2316_v55 }
  0xbd   :  { %1502 = vmatpush1.bf16.msra.mxu0 %v2312_v54  ;;  %2048 = vmatprep.subr.bf16.mxu1 %v2320_v57 }
  0xbe   :  { %1503 = vmatprep.subr.bf16.mxu0 %v2319_v56 }
  0xc0   :  { %2049 = vmatpush3.bf16.msra.mxu1 %v2321_v59 }
  0xc1   :  { %1504 = vmatpush1.bf16.msra.mxu0 %v2317_v58  ;;  %2050 = vmatprep.subr.bf16.mxu1 %v2325_v52  ;;  %v1683_v58 = vand.u32 127, %v291_v22 }
  0xc2   :  { %1505 = vmatprep.subr.bf16.mxu0 %v2324_v60 }
  0xc4   :  { %2051 = vmatpush3.bf16.msra.mxu1 %v2326_v62 }
  0xc5   :  { %1506 = vmatpush1.bf16.msra.mxu0 %v2322_v61  ;;  %2052 = vmatprep.subr.bf16.mxu1 %v2330_v0 }
  0xc6   :  { %1507 = vmatprep.subr.bf16.mxu0 %v2329_v63 }
  0xc8   :  { %2053 = vmatpush3.bf16.msra.mxu1 %v2331_v2 }
  0xc9   :  { %1508 = vmatpush1.bf16.msra.mxu0 %v2327_v1  ;;  %2054 = vmatprep.subr.bf16.mxu1 %v2335_v4 }
  0xca   :  { %1509 = vmatprep.subr.bf16.mxu0 %v2334_v3 }
  0xcc   :  { %2055 = vmatpush3.bf16.msra.mxu1 %v2336_v6 }
  0xcd   :  { %1510 = vmatpush1.bf16.msra.mxu0 %v2332_v5  ;;  %2056 = vmatprep.subr.bf16.mxu1 %v2340_v9 }
  0xce   :  { %1511 = vmatprep.subr.bf16.mxu0 %v2339_v8 }
  0xd0   :  { %2057 = vmatpush3.bf16.msra.mxu1 %v2341_v11 }
  0xd1   :  { %1512 = vmatpush1.bf16.msra.mxu0 %v2337_v10 }
  0xd3   :  { %1675 = vmatmul.mubr.bf16.vlgmr.msra.gmra.mrb[16].mxu1 %v1782_v12 }
  0xd4   :  { %1514 = vmatmul.mubr.bf16.vlgmr.msra.gmra.mrb[0].mxu0 %v1782_v12 }
 0x126   :  { %v1392_v13 = vpop.f32.mrb[0].mxu1 }
 0x127   :  { %v1394_v14 = vpop.f32.mrb[1].mxu1  ;;  %v1393_v43 = vadd.f32 %v1392_v13, %v294_v41 }
 0x128   :  { %v1396_v15 = vpop.f32.mrb[2].mxu1  ;;  %v1395_v44 = vadd.f32 %v1394_v14, %v298_v42 }
 0x129   :  { %v1397_v16 = vpop.f32.mrb[3].mxu1 }
 0x146   :  { %v1992_v17 = vpop.f32.mrb[4].mxu1 }
 0x147   :  { %v1993_v18 = vpop.f32.mrb[5].mxu1 }
 0x148   :  { %v1994_v19 = vadd.f32 %v1993_v18, %v1992_v17  ;;  %v1995_v20 = vpop.f32.mrb[6].mxu1 }
 0x149   :  { %v1996_v21 = vpop.f32.mrb[7].mxu1 }
 0x14a   :  { %v1557_v28 = vadd.f32 %v1994_v19, %v302_v25 }
 0x166   :  { %v2014_v26 = vpop.f32.mrb[8].mxu1 }
 0x167   :  { %v2015_v27 = vpop.f32.mrb[9].mxu1 }
 0x168   :  { %v2016_v29 = vadd.f32 %v2015_v27, %v2014_v26  ;;  %v2017_v30 = vpop.f32.mrb[10].mxu1 }
 0x169   :  { %v2018_v31 = vpop.f32.mrb[11].mxu1 }
 0x16a   :  { %v1597_v32 = vadd.f32 %v2016_v29, %v1557_v28 }
 0x186   :  { %v2036_v33 = vpop.f32.mrb[12].mxu1 }
 0x187   :  { %v2037_v34 = vpop.f32.mrb[13].mxu1 }
 0x188   :  { %v2038_v35 = vadd.f32 %v2037_v34, %v2036_v33  ;;  %v2039_v36 = vpop.f32.mrb[14].mxu1  ;;  %v2371_v33 = vmov 0  }
 0x189   :  { %v2040_v37 = vpop.f32.mrb[15].mxu1 }
 0x18a   :  { %v1637_v38 = vadd.f32 %v2038_v35, %v1597_v32 }
 0x1a6   :  { %v2058_v46 = vpop.f32.mrb[16].mxu1 }
 0x1a7   :  { %v1515_v45 = vpop.f32.mrb[0].mxu0  ;;  %v2059_v49 = vpop.f32.mrb[17].mxu1 }
 0x1a8   :  { %v2065_v47 = vadd.f32 %v1515_v45, %v1393_v43  ;;  %v1517_v48 = vpop.f32.mrb[1].mxu0  ;;  %v2060_v51 = vadd.f32 %v2059_v49, %v2058_v46  ;;  %v2061_v54 = vpop.f32.mrb[18].mxu1 }
 0x1a9   :  { %v2067_v50 = vadd.f32 %v1517_v48, %v1395_v44  ;;  %v1519_v53 = vpop.f32.mrb[2].mxu0  ;;  %v2062_v56 = vpop.f32.mrb[19].mxu1 }
 0x1aa   :  { %v1520_v55 = vpop.f32.mrb[3].mxu0  ;;  %1684 = vmax.xlane.f32.xlu0 %v2065_v47  ;;  %v1677_v57 = vadd.f32 %v2060_v51, %v1637_v38 }
 0x1ac   :  { %1720 = vmax.xlane.f32.xlu1 %v1677_v57 }
 0x1ae   :  { %1702 = vmax.xlane.f32.xlu0 %v2067_v50 }
 0x237   :  { %v1685_v59 = vpop.xlane.xlu0 %1684 }
 0x238   :  { %vm1686_vm0 = vcmp.eq.f32.partialorder %v2065_v47, %v1685_v59 }
 0x239   :  { %v1687_v60 = vsel %vm1686_vm0, %v1683_v58, 128  ;;  %v1721_v52 = vpop.xlane.xlu1 %1720 }
 0x23a   :  { %v1689_v61 = vshra.s32 %v1687_v60, 16  ;;  %vm1722_vm1 = vcmp.eq.f32.partialorder %v1677_v57, %v1721_v52  ;;  %v1688_v6 = vand.u32 65535, %v1687_v60 }
 0x23b   :  { %v1703_v62 = vpop.xlane.xlu0 %1702  ;;  %v1723_v63 = vsel %vm1722_vm1, %v1683_v58, 128 }
 0x23c   :  { %vm1704_vm2 = vcmp.eq.f32.partialorder %v2067_v50, %v1703_v62  ;;  %v1691_v0 = vcvt.s32.f32 %v1689_v61  ;;  %v1725_v2 = vshra.s32 %v1723_v63, 16  ;;  %v1724_v8 = vand.u32 65535, %v1723_v63 }
 0x23d   :  { %v1705_v1 = vsel %vm1704_vm2, %v1683_v58, 128  ;;  %v1690_v11 = vcvt.s32.f32 %v1688_v6 }
 0x23e   :  { %1692 = vmin.xlane.f32.xlu1 %v1691_v0  ;;  %v1707_v3 = vshra.s32 %v1705_v1, 16  ;;  %v1727_v4 = vcvt.s32.f32 %v1725_v2  ;;  %v1706_v9 = vand.u32 65535, %v1705_v1  ;;  %v1726_v15 = vcvt.s32.f32 %v1724_v8 }
 0x240   :  { %v1709_v5 = vcvt.s32.f32 %v1707_v3  ;;  %v1708_v16 = vcvt.s32.f32 %v1706_v9 }
 0x242   :  { %1728 = vmin.xlane.f32.xlu1 %v1727_v4  ;;  %1710 = vmin.xlane.f32.xlu0 %v1709_v5 }
 0x2cb   :  { %v1693_v10 = vpop.xlane.xlu1 %1692 }
 0x2cc   :  { %vm1694_vm3 = vcmp.eq.f32.partialorder %v1691_v0, %v1693_v10  ;;  %v1699_v19 = vcvt.f32.s32 %v1693_v10 }
 0x2cd   :  { %v1695_v12 = vsel %vm1694_vm3, %v1690_v11, inf }
 0x2ce   :  { %1696 = vmin.xlane.f32.xlu0 %v1695_v12  ;;  %v1700_v23 = vshll.u32 %v1699_v19, 16 }
 0x2cf   :  { %v1729_v13 = vpop.xlane.xlu1 %1728  ;;  %v1711_v14 = vpop.xlane.xlu0 %1710 }
 0x2d0   :  { %vm1730_vm4 = vcmp.eq.f32.partialorder %v1727_v4, %v1729_v13  ;;  %vm1712_vm5 = vcmp.eq.f32.partialorder %v1709_v5, %v1711_v14  ;;  %v1735_v21 = vcvt.f32.s32 %v1729_v13  ;;  %v1717_v22 = vcvt.f32.s32 %v1711_v14 }
 0x2d1   :  { %v1731_v17 = vsel %vm1730_vm4, %v1726_v15, inf  ;;  %v1713_v18 = vsel %vm1712_vm5, %v1708_v16, inf }
 0x2d2   :  { %1732 = vmin.xlane.f32.xlu0 %v1731_v17  ;;  %1714 = vmin.xlane.f32.xlu1 %v1713_v18  ;;  %v1736_v26 = vshll.u32 %v1735_v21, 16  ;;  %v1718_v27 = vshll.u32 %v1717_v22, 16 }
 0x35b   :  { %v1697_v20 = vpop.xlane.xlu0 %1696 }
 0x35c   :  { %v1698_v7 = vcvt.f32.s32 %v1697_v20 }
 0x35e   :  { %v1701_v30 = vadd.s32 %v1700_v23, %v1698_v7 }
 0x35f   :  { %v1733_v24 = vpop.xlane.xlu0 %1732  ;;  %v1715_v25 = vpop.xlane.xlu1 %1714 }
 0x360   :  { %v1734_v28 = vcvt.f32.s32 %v1733_v24  ;;  %v1716_v29 = vcvt.f32.s32 %v1715_v25 }
 0x362   :  { %v1737_v31 = vadd.s32 %v1736_v26, %v1734_v28  ;;  %v1719_v32 = vadd.s32 %v1718_v27, %v1716_v29 }
 0x364   :  { %vm1741_vm6 = vcmp.eq.s32.totalorder %v1737_v31, %v1701_v30  ;;  %vm1760_vm7 = vcmp.eq.s32.totalorder %v1701_v30, %v1737_v31  ;;  %vm1738_vm8 = vcmp.eq.s32.totalorder %v1719_v32, %v1701_v30  ;;  %vm1749_vm9 = vcmp.eq.s32.totalorder %v1701_v30, %v1719_v32 }
 0x365   :  { %v1761_v34 = vsel %vm1760_vm7, 1, %v2371_v33  ;;  %v1739_v35 = vsel %vm1738_vm8, 1, %v2371_v33  ;;  %v1750_v36 = vsel %vm1749_vm9, 1, %v2371_v33  ;;  %vm1752_vm10 = vcmp.eq.s32.totalorder %v1737_v31, %v1719_v32 }
 0x366   :  { %v1740_v37 = vadd.s32 1, %v1739_v35  ;;  %v1751_v38 = vadd.s32 1, %v1750_v36  ;;  %vm1762_vm11 = vcmp.eq.s32.totalorder %v1719_v32, %v1737_v31  ;;  %v1742_v39 = vsel %vm1741_vm6, 1, %v2371_v33 }
 0x367   :  { %v1753_v40 = vsel %vm1752_vm10, 1, %v2371_v33  ;;  %v1763_v41 = vsel %vm1762_vm11, 1, %v2371_v33 }
 0x368   :  { %v1743_v42 = vadd.s32 %v1742_v39, %v1740_v37  ;;  %v1754_v43 = vadd.s32 %v1753_v40, %v1751_v38  ;;  %v1764_v44 = vadd.s32 %v1763_v41, %v1761_v34 }
 0x36a   :  { %v1744_v45 = vmul.u32 65536, %v1743_v42  ;;  %v1755_v46 = vmul.u32 65536, %v1754_v43  ;;  %v1765_v47 = vadd.s32 1, %v1764_v44 }
 0x36c   :  { %v1745_v48 = vsub.s32 %v1744_v45, %v1701_v30  ;;  %v1766_v49 = vmul.u32 65536, %v1765_v47  ;;  %v1756_v50 = vsub.s32 %v1755_v46, %v1719_v32 }
 0x36e   :  { %vm1746_vm12 = vcmp.gt.s32.totalorder %v1745_v48, 4294967295  ;;  %v1767_v54 = vsub.s32 %v1766_v49, %v1737_v31 }
 0x36f   :  { %v1747_v51 = vsel %vm1746_vm12, %v1745_v48, 4294967295  ;;  %v1748_v53 = vsel %vm1746_vm12, %v1701_v30, 0 }
 0x370   :  { %vm1757_vm13 = vcmp.gt.s32.totalorder %v1756_v50, %v1747_v51 }
 0x371   :  { %v1758_v55 = vsel %vm1757_vm13, %v1756_v50, %v1747_v51  ;;  %v1759_v56 = vsel %vm1757_vm13, %v1719_v32, %v1748_v53 }
 0x372   :  { %vm1768_vm14 = vcmp.gt.s32.totalorder %v1767_v54, %v1758_v55 }
 0x373   :  { %v1769_v57 = vsel %vm1768_vm14, %v1737_v31, %v1759_v56 }
 0x374   :  { %1770 = vst [vmem:[%s2461_s3] sm:$0xff] %v1769_v57 }
 0x375   :  { %1775 = vsyncpa [#allocation3], 1 }

</bundles_post_ra>
